<compile_context>
chip_gen: v6e
topology: v6e:2x2x1
jax: 0.10.0
libtpu: 0.0.40
codegen_flags: <defaults>
</compile_context>

<pallas_src>
import functools

import jax
import jax.numpy as jnp
from jax import lax
from jax.experimental import pallas as pl
from jax.experimental.pallas import tpu as pltpu


def _ho_kernel(f_ref, omega_ref, gamma_ref, alpha_ref, x0_ref, y0_ref,
               xout_ref, xstate_ref, ystate_ref, *, true_b, tb):
    bi = pl.program_id(1)                       # batch-tile index (last, 'arbitrary')

    f = f_ref[...]                              # (TB, TS)
    omega = omega_ref[...]                      # (1, TS)
    gamma = gamma_ref[...]
    alpha = alpha_ref[...]
    x0 = x0_ref[...]                            # (1, TS)
    y0 = y0_ref[...]

    # ---- batch-invariant algebra, computed once at (1, TS) rank ----------
    c = 2.0 * jnp.abs(gamma) * y0 + (omega * omega) * x0        # |w|^2 == w^2
    x_new = x0 + 0.5 * y0
    x_next = 0.9 * jnp.clip(x_new, -5.0, 5.0) + 0.1 * x0        # (1, TS)

    # ---- batch-dependent y path -------------------------------------------
    accel = alpha * f - c                                       # (TB, TS)
    y_new = y0 + 0.5 * accel
    y_next = 0.9 * jnp.clip(y_new, -5.0, 5.0) + 0.1 * y0        # (TB, TS)

    # Forward return value: x_next is identical for every batch row.
    xout_ref[...] = jnp.broadcast_to(x_next, f.shape)
    # New self.x buffer (== its batch mean, since all rows are identical).
    xstate_ref[...] = x_next

    # New self.y buffer: accumulate the batch-sum across batch tiles in the
    # resident (1, TS) output block, divide by the true batch size at the end.
    @pl.when(bi == 0)
    def _():
        ystate_ref[...] = jnp.zeros_like(ystate_ref)

    if true_b % tb == 0:
        partial = jnp.sum(y_next, axis=0, keepdims=True)
    else:
        # Partial boundary batch tile: rows >= true_b hold undefined data
        # (non-divisible grid) -> exclude them (jnp.where, so NaNs don't leak).
        rows = bi * tb + lax.broadcasted_iota(jnp.int32, y_next.shape, 0)
        partial = jnp.sum(jnp.where(rows < true_b, y_next, 0.0),
                          axis=0, keepdims=True)
    ystate_ref[...] += partial

    @pl.when(bi == pl.num_programs(1) - 1)
    def _():
        ystate_ref[...] = ystate_ref[...] * (1.0 / true_b)


@functools.partial(jax.jit, static_argnames=("max_tb", "max_ts"))
def harmonic_oscillator_forward(input_force, omega, gamma, alpha,
                                x_state, y_state, *,
                                max_tb=256, max_ts=2048):
    """Functional forward.

    Args:
      input_force: (B, S) float32
      omega, gamma, alpha: (S,) float32 parameters
      x_state, y_state: (1, S) float32 persistent buffers
    Returns:
      (x_out (B, S), new_x_state (1, S), new_y_state (1, S))
    """
    B, S = input_force.shape
    f32 = jnp.float32

    # Tile sizes: either the full dim, or an (8,128)-aligned tile of it.
    # (max_tb is a multiple of 8, max_ts a multiple of 128.)
    tb = B if B <= max_tb else max_tb
    ts = S if S <= max_ts else max_ts

    f = input_force.astype(f32)
    omega2 = omega.reshape(1, S).astype(f32)
    gamma2 = gamma.reshape(1, S).astype(f32)
    alpha2 = alpha.reshape(1, S).astype(f32)
    x0 = x_state.reshape(1, S).astype(f32)
    y0 = y_state.reshape(1, S).astype(f32)

    grid = (pl.cdiv(S, ts), pl.cdiv(B, tb))   # (S tiles [parallel], batch tiles [arbitrary])

    big_spec = pl.BlockSpec((tb, ts), lambda sj, bi: (bi, sj))
    row_spec = pl.BlockSpec((1, ts), lambda sj, bi: (0, sj))

    x_out, new_x_state, new_y_state = pl.pallas_call(
        functools.partial(_ho_kernel, true_b=B, tb=tb),
        grid=grid,
        in_specs=[
            big_spec,   # input_force
            row_spec,   # omega
            row_spec,   # gamma
            row_spec,   # alpha
            row_spec,   # x state
            row_spec,   # y state
        ],
        out_specs=[
            big_spec,                                       # x_out
            pl.BlockSpec((1, ts), lambda sj, bi: (0, sj)),  # new x state
            pl.BlockSpec((1, ts), lambda sj, bi: (0, sj)),  # new y state (accumulator)
        ],
        out_shape=[
            jax.ShapeDtypeStruct((B, S), f32),
            jax.ShapeDtypeStruct((1, S), f32),
            jax.ShapeDtypeStruct((1, S), f32),
        ],
        compiler_params=pltpu.CompilerParams(
            dimension_semantics=("parallel", "arbitrary")),
    )(f, omega2, gamma2, alpha2, x0, y0)

    return x_out, new_x_state, new_y_state


def _reference(input_force, omega, gamma, alpha, x_state, y_state):
    """Pure-JAX reference mirroring the PyTorch forward."""
    B = input_force.shape[0]
    x = jnp.tile(x_state, (B, 1))
    y = jnp.tile(y_state, (B, 1))
    accel = alpha * input_force - 2.0 * jnp.abs(gamma) * y - jnp.abs(omega) ** 2 * x
    h = 0.5
    x_new = x + h * y
    y_new = y + h * accel
    x = 0.9 * jnp.clip(x_new, -5.0, 5.0) + 0.1 * x
    y = 0.9 * jnp.clip(y_new, -5.0, 5.0) + 0.1 * y
    return x, jnp.mean(x, axis=0, keepdims=True), jnp.mean(y, axis=0, keepdims=True)


if __name__ == "__main__":
    import numpy as np

    key = jax.random.PRNGKey(0)

    # ---- Test 1: module-consistent small shape, two steps carrying state ----
    B, S = 4, 32
    k_f, k_w, k_g, k_a, _ = jax.random.split(key, 5)
    omega = jax.random.uniform(k_w, (S,), jnp.float32, 1.0, 3.0)
    gamma = jax.random.uniform(k_g, (S,), jnp.float32, 0.1, 0.5)
    alpha = jax.random.uniform(k_a, (S,), jnp.float32, 0.5, 1.5)
    x_state = jnp.zeros((1, S), jnp.float32)
    y_state = jnp.zeros((1, S), jnp.float32)
    input_force = jax.random.normal(k_f, (B, S), jnp.float32)

    x_out, xs2, ys2 = harmonic_oscillator_forward(
        input_force, omega, gamma, alpha, x_state, y_state)
    x_out2, xs3, ys3 = harmonic_oscillator_forward(
        input_force, omega, gamma, alpha, xs2, ys2)
    jax.block_until_ready((x_out, x_out2, xs3, ys3))

    r1 = _reference(input_force, omega, gamma, alpha, x_state, y_state)
    r2 = _reference(input_force, omega, gamma, alpha, r1[1], r1[2])
    np.testing.assert_allclose(np.asarray(x_out), np.asarray(r1[0]), rtol=1e-5, atol=1e-6)
    np.testing.assert_allclose(np.asarray(xs2), np.asarray(r1[1]), rtol=1e-5, atol=1e-6)
    np.testing.assert_allclose(np.asarray(ys2), np.asarray(r1[2]), rtol=1e-5, atol=1e-6)
    np.testing.assert_allclose(np.asarray(x_out2), np.asarray(r2[0]), rtol=1e-5, atol=1e-6)
    np.testing.assert_allclose(np.asarray(xs3), np.asarray(r2[1]), rtol=1e-5, atol=1e-6)
    np.testing.assert_allclose(np.asarray(ys3), np.asarray(r2[2]), rtol=1e-5, atol=1e-6)

    # ---- Test 2: multi-tile grid with partial boundary blocks (B, S not
    # multiples of the tile) and masked batch-mean accumulation. ------------
    B2, S2 = 20, 200
    kf, kw, kg, ka, kx, ky = jax.random.split(jax.random.PRNGKey(1), 6)
    omega2 = jax.random.uniform(kw, (S2,), jnp.float32, 1.0, 3.0)
    gamma2 = jax.random.uniform(kg, (S2,), jnp.float32, 0.1, 0.5)
    alpha2 = jax.random.uniform(ka, (S2,), jnp.float32, 0.5, 1.5)
    xst2 = jax.random.normal(kx, (1, S2), jnp.float32) * 0.1
    yst2 = jax.random.normal(ky, (1, S2), jnp.float32) * 0.1
    force2 = jax.random.normal(kf, (B2, S2), jnp.float32)

    xo, xs, ys = harmonic_oscillator_forward(
        force2, omega2, gamma2, alpha2, xst2, yst2, max_tb=8, max_ts=128)
    jax.block_until_ready((xo, xs, ys))
    rr = _reference(force2, omega2, gamma2, alpha2, xst2, yst2)
    np.testing.assert_allclose(np.asarray(xo), np.asarray(rr[0]), rtol=1e-5, atol=1e-5)
    np.testing.assert_allclose(np.asarray(xs), np.asarray(rr[1]), rtol=1e-5, atol=1e-5)
    np.testing.assert_allclose(np.asarray(ys), np.asarray(rr[2]), rtol=1e-5, atol=1e-5)

    print("KERNEL_OK")
</pallas_src>

<mosaic_0001>
module attributes {stable_mosaic.version = 11 : i64} {
  func.func @_ho_kernel(%arg0: i32, %arg1: i32, %arg2: memref<4x32xf32, #tpu.memory_space<vmem>>, %arg3: memref<1x32xf32, #tpu.memory_space<vmem>>, %arg4: memref<1x32xf32, #tpu.memory_space<vmem>>, %arg5: memref<1x32xf32, #tpu.memory_space<vmem>>, %arg6: memref<1x32xf32, #tpu.memory_space<vmem>>, %arg7: memref<1x32xf32, #tpu.memory_space<vmem>>, %arg8: memref<4x32xf32, #tpu.memory_space<vmem>>, %arg9: memref<1x32xf32, #tpu.memory_space<vmem>>, %arg10: memref<1x32xf32, #tpu.memory_space<vmem>>) attributes {dimension_semantics = [#tpu.dimension_semantics<parallel>, #tpu.dimension_semantics<arbitrary>], iteration_bounds = array<i64: 1, 1>, scalar_prefetch = 0 : i64, scratch_operands = 0 : i64, tpu.core_type = #tpu.core_type<tc>, window_params = [{transform_indices = @transform_0, window_bounds = array<i64: 4, 32>}, {transform_indices = @transform_1, window_bounds = array<i64: 1, 32>}, {transform_indices = @transform_2, window_bounds = array<i64: 1, 32>}, {transform_indices = @transform_3, window_bounds = array<i64: 1, 32>}, {transform_indices = @transform_4, window_bounds = array<i64: 1, 32>}, {transform_indices = @transform_5, window_bounds = array<i64: 1, 32>}, {transform_indices = @transform_6, window_bounds = array<i64: 4, 32>}, {transform_indices = @transform_7, window_bounds = array<i64: 1, 32>}, {transform_indices = @transform_8, window_bounds = array<i64: 1, 32>}]} {
    %c0 = arith.constant 0 : index
    %c0_0 = arith.constant 0 : index
    %0 = vector.load %arg2[%c0, %c0_0] : memref<4x32xf32, #tpu.memory_space<vmem>>, vector<4x32xf32>
    %c0_1 = arith.constant 0 : index
    %c0_2 = arith.constant 0 : index
    %1 = vector.load %arg3[%c0_1, %c0_2] : memref<1x32xf32, #tpu.memory_space<vmem>>, vector<1x32xf32>
    %c0_3 = arith.constant 0 : index
    %c0_4 = arith.constant 0 : index
    %2 = vector.load %arg4[%c0_3, %c0_4] : memref<1x32xf32, #tpu.memory_space<vmem>>, vector<1x32xf32>
    %c0_5 = arith.constant 0 : index
    %c0_6 = arith.constant 0 : index
    %3 = vector.load %arg5[%c0_5, %c0_6] : memref<1x32xf32, #tpu.memory_space<vmem>>, vector<1x32xf32>
    %c0_7 = arith.constant 0 : index
    %c0_8 = arith.constant 0 : index
    %4 = vector.load %arg6[%c0_7, %c0_8] : memref<1x32xf32, #tpu.memory_space<vmem>>, vector<1x32xf32>
    %c0_9 = arith.constant 0 : index
    %c0_10 = arith.constant 0 : index
    %5 = vector.load %arg7[%c0_9, %c0_10] : memref<1x32xf32, #tpu.memory_space<vmem>>, vector<1x32xf32>
    %6 = math.absf %2 : vector<1x32xf32>
    %cst = arith.constant 2.000000e+00 : f32
    %7 = vector.broadcast %cst : f32 to vector<1x32xf32>
    %8 = arith.mulf %7, %6 : vector<1x32xf32>
    %9 = arith.mulf %8, %5 : vector<1x32xf32>
    %10 = arith.mulf %1, %1 : vector<1x32xf32>
    %11 = arith.mulf %10, %4 : vector<1x32xf32>
    %12 = arith.addf %9, %11 : vector<1x32xf32>
    %cst_11 = arith.constant 5.000000e-01 : f32
    %13 = vector.broadcast %cst_11 : f32 to vector<1x32xf32>
    %14 = arith.mulf %13, %5 : vector<1x32xf32>
    %15 = arith.addf %4, %14 : vector<1x32xf32>
    %cst_12 = arith.constant -5.000000e+00 : f32
    %cst_13 = arith.constant 5.000000e+00 : f32
    %16 = vector.broadcast %cst_12 : f32 to vector<1x32xf32>
    %17 = arith.maximumf %16, %15 : vector<1x32xf32>
    %18 = vector.broadcast %cst_13 : f32 to vector<1x32xf32>
    %19 = arith.minimumf %18, %17 : vector<1x32xf32>
    %cst_14 = arith.constant 0.899999976 : f32
    %20 = vector.broadcast %cst_14 : f32 to vector<1x32xf32>
    %21 = arith.mulf %20, %19 : vector<1x32xf32>
    %cst_15 = arith.constant 1.000000e-01 : f32
    %22 = vector.broadcast %cst_15 : f32 to vector<1x32xf32>
    %23 = arith.mulf %22, %4 : vector<1x32xf32>
    %24 = arith.addf %21, %23 : vector<1x32xf32>
    %25 = vector.broadcast %3 : vector<1x32xf32> to vector<4x32xf32>
    %26 = arith.mulf %25, %0 : vector<4x32xf32>
    %27 = vector.broadcast %12 : vector<1x32xf32> to vector<4x32xf32>
    %28 = arith.subf %26, %27 : vector<4x32xf32>
    %cst_16 = arith.constant 5.000000e-01 : f32
    %29 = vector.broadcast %cst_16 : f32 to vector<4x32xf32>
    %30 = arith.mulf %29, %28 : vector<4x32xf32>
    %31 = vector.broadcast %5 : vector<1x32xf32> to vector<4x32xf32>
    %32 = arith.addf %31, %30 : vector<4x32xf32>
    %cst_17 = arith.constant -5.000000e+00 : f32
    %cst_18 = arith.constant 5.000000e+00 : f32
    %33 = vector.broadcast %cst_17 : f32 to vector<4x32xf32>
    %34 = arith.maximumf %33, %32 : vector<4x32xf32>
    %35 = vector.broadcast %cst_18 : f32 to vector<4x32xf32>
    %36 = arith.minimumf %35, %34 : vector<4x32xf32>
    %cst_19 = arith.constant 0.899999976 : f32
    %37 = vector.broadcast %cst_19 : f32 to vector<4x32xf32>
    %38 = arith.mulf %37, %36 : vector<4x32xf32>
    %cst_20 = arith.constant 1.000000e-01 : f32
    %39 = vector.broadcast %cst_20 : f32 to vector<1x32xf32>
    %40 = arith.mulf %39, %5 : vector<1x32xf32>
    %41 = vector.broadcast %40 : vector<1x32xf32> to vector<4x32xf32>
    %42 = arith.addf %38, %41 : vector<4x32xf32>
    %43 = vector.shape_cast %24 : vector<1x32xf32> to vector<1x32xf32>
    %44 = vector.broadcast %43 : vector<1x32xf32> to vector<4x32xf32>
    %c0_21 = arith.constant 0 : index
    %c0_22 = arith.constant 0 : index
    %45 = vector.load %arg8[%c0_21, %c0_22] : memref<4x32xf32, #tpu.memory_space<vmem>>, vector<4x32xf32>
    tpu.vector_store %arg8[%c0_21, %c0_22], %44 {strides = array<i32>} : memref<4x32xf32, #tpu.memory_space<vmem>>, vector<4x32xf32>,
    %c0_23 = arith.constant 0 : index
    %c0_24 = arith.constant 0 : index
    %46 = vector.load %arg9[%c0_23, %c0_24] : memref<1x32xf32, #tpu.memory_space<vmem>>, vector<1x32xf32>
    tpu.vector_store %arg9[%c0_23, %c0_24], %24 {strides = array<i32>} : memref<1x32xf32, #tpu.memory_space<vmem>>, vector<1x32xf32>,
    %c0_i32 = arith.constant 0 : i32
    %47 = arith.cmpi eq, %arg1, %c0_i32 : i32
    %48 = arith.extui %47 : i1 to i32
    %c0_i32_25 = arith.constant 0 : i32
    %49 = arith.cmpi ne, %48, %c0_i32_25 : i32
    scf.if %49 {
      %cst_33 = arith.constant 0.000000e+00 : f32
      %58 = vector.broadcast %cst_33 : f32 to vector<1x32xf32>
      %c0_34 = arith.constant 0 : index
      %c0_35 = arith.constant 0 : index
      %59 = vector.load %arg10[%c0_34, %c0_35] : memref<1x32xf32, #tpu.memory_space<vmem>>, vector<1x32xf32>
      tpu.vector_store %arg10[%c0_34, %c0_35], %58 {strides = array<i32>} : memref<1x32xf32, #tpu.memory_space<vmem>>, vector<1x32xf32>,
    } else {
    }
    %cst_26 = arith.constant dense<0.000000e+00> : vector<32xf32>
    %50 = vector.multi_reduction <add>, %42, %cst_26 [0] : vector<4x32xf32> to vector<32xf32>
    %51 = vector.shape_cast %50 : vector<32xf32> to vector<1x32xf32>
    %c0_27 = arith.constant 0 : index
    %c0_28 = arith.constant 0 : index
    %52 = vector.load %arg10[%c0_27, %c0_28] : memref<1x32xf32, #tpu.memory_space<vmem>>, vector<1x32xf32>
    %53 = arith.addf %52, %51 : vector<1x32xf32>
    %c0_29 = arith.constant 0 : index
    %c0_30 = arith.constant 0 : index
    %54 = vector.load %arg10[%c0_29, %c0_30] : memref<1x32xf32, #tpu.memory_space<vmem>>, vector<1x32xf32>
    tpu.vector_store %arg10[%c0_29, %c0_30], %53 {strides = array<i32>} : memref<1x32xf32, #tpu.memory_space<vmem>>, vector<1x32xf32>,
    %c0_i32_31 = arith.constant 0 : i32
    %55 = arith.cmpi eq, %arg1, %c0_i32_31 : i32
    %56 = arith.extui %55 : i1 to i32
    %c0_i32_32 = arith.constant 0 : i32
    %57 = arith.cmpi ne, %56, %c0_i32_32 : i32
    scf.if %57 {
      %c0_33 = arith.constant 0 : index
      %c0_34 = arith.constant 0 : index
      %58 = vector.load %arg10[%c0_33, %c0_34] : memref<1x32xf32, #tpu.memory_space<vmem>>, vector<1x32xf32>
      %cst_35 = arith.constant 2.500000e-01 : f32
      %59 = vector.broadcast %cst_35 : f32 to vector<1x32xf32>
      %60 = arith.mulf %58, %59 : vector<1x32xf32>
      %c0_36 = arith.constant 0 : index
      %c0_37 = arith.constant 0 : index
      %61 = vector.load %arg10[%c0_36, %c0_37] : memref<1x32xf32, #tpu.memory_space<vmem>>, vector<1x32xf32>
      tpu.vector_store %arg10[%c0_36, %c0_37], %60 {strides = array<i32>} : memref<1x32xf32, #tpu.memory_space<vmem>>, vector<1x32xf32>,
    } else {
    }
    return
  }
  func.func @transform_0(%arg0: i32, %arg1: i32) -> (i32, i32) {
    %c0_i32 = arith.constant 0 : i32
    return %arg1, %arg0 : i32, i32
  }
  func.func @transform_1(%arg0: i32, %arg1: i32) -> (i32, i32) {
    %c0_i32 = arith.constant 0 : i32
    %c0_i32_0 = arith.constant 0 : i32
    return %c0_i32, %arg0 : i32, i32
  }
  func.func @transform_2(%arg0: i32, %arg1: i32) -> (i32, i32) {
    %c0_i32 = arith.constant 0 : i32
    %c0_i32_0 = arith.constant 0 : i32
    return %c0_i32, %arg0 : i32, i32
  }
  func.func @transform_3(%arg0: i32, %arg1: i32) -> (i32, i32) {
    %c0_i32 = arith.constant 0 : i32
    %c0_i32_0 = arith.constant 0 : i32
    return %c0_i32, %arg0 : i32, i32
  }
  func.func @transform_4(%arg0: i32, %arg1: i32) -> (i32, i32) {
    %c0_i32 = arith.constant 0 : i32
    %c0_i32_0 = arith.constant 0 : i32
    return %c0_i32, %arg0 : i32, i32
  }
  func.func @transform_5(%arg0: i32, %arg1: i32) -> (i32, i32) {
    %c0_i32 = arith.constant 0 : i32
    %c0_i32_0 = arith.constant 0 : i32
    return %c0_i32, %arg0 : i32, i32
  }
  func.func @transform_6(%arg0: i32, %arg1: i32) -> (i32, i32) {
    %c0_i32 = arith.constant 0 : i32
    return %arg1, %arg0 : i32, i32
  }
  func.func @transform_7(%arg0: i32, %arg1: i32) -> (i32, i32) {
    %c0_i32 = arith.constant 0 : i32
    %c0_i32_0 = arith.constant 0 : i32
    return %c0_i32, %arg0 : i32, i32
  }
  func.func @transform_8(%arg0: i32, %arg1: i32) -> (i32, i32) {
    %c0_i32 = arith.constant 0 : i32
    %c0_i32_0 = arith.constant 0 : i32
    return %c0_i32, %arg0 : i32, i32
  }
}

</mosaic_0001>

<bundles_post_ra>
// kernel: harmonic_oscillator_forward.1
= control target key start
LH: loop header
LB: loop body
LE: loop exit
PB: predicated region body
PF: predicated region fallthrough
CT: control target
= control target key end

     0   :  { %14 = vsyncpa [#allocation3], 0  ;;  %vm88_vm0 = vcmask 253952   ;;  %v55_v1 = vlaneseq  ;;  %v223_v2 = vmov 0.0   ;;  %s305_s0 = inlined_call_operand.vmem [shape: f32[4,32], index: 0, kind: input, shape index: {}]   ;;  %s306_s1 = inlined_call_operand.vmem [shape: f32[1,32], index: 1, kind: input, shape index: {}]   ;;  %s307_s2 = inlined_call_operand.vmem [shape: f32[1,32], index: 2, kind: input, shape index: {}]   ;;  %s308_s3 = inlined_call_operand.vmem [shape: f32[1,32], index: 3, kind: input, shape index: {}]   ;;  %s309_s4 = inlined_call_operand.vmem [shape: f32[1,32], index: 4, kind: input, shape index: {}]   ;;  %s310_s5 = inlined_call_operand.vmem [shape: f32[1,32], index: 5, kind: input, shape index: {}]   ;;  %s311_s6 = inlined_call_operand.hbm [shape: f32[4,32], index: 6, kind: output, shape index: {0}]   ;;  %s312_s7 = inlined_call_operand.hbm [shape: f32[1,32], index: 7, kind: output, shape index: {1}]   ;;  %s313_s8 = inlined_call_operand.hbm [shape: f32[1,32], index: 8, kind: output, shape index: {2}]  }
   0x1   :  { %v29_v0 = vld [vmem:[%s306_s1] sm:$0x1]  ;;  %94 = vst.msk [vmem:[#allocation6] sm:$0x1] %vm88_vm0, %v223_v2 }
   0x2   :  { %v30_v3 = vld [vmem:[%s307_s2] sm:$0x1]  ;;  %v37_v5 = vmul.f32 %v29_v0, %v29_v0  ;;  %v56_v8 = vshrl.u32 %v55_v1, 7 }
   0x3   :  { %v32_v4 = vld [vmem:[%s309_s4] sm:$0x1]  ;;  %v34_v7 = vand.u32 2147483647, %v30_v3 }
   0x4   :  { %v33_v6 = vld [vmem:[%s310_s5] sm:$0x1]  ;;  %v38_v11 = vmul.f32 %v37_v5, %v32_v4 }
   0x5   :  { %v40_v9 = vmul.f32 0.5, %v33_v6  ;;  %v35_v10 = vmul.f32 2.0, %v34_v7 }
   0x6   :  { %15 = vsyncpa [#allocation5], 0  ;;  %v28_v12 = vld [vmem:[%s305_s0] sm:$0xf]  ;;  %v57_v16 = vsub.s32 0, %v56_v8  ;;  %s224_s4 = smov [#allocation4]  }
   0x7   :  { %v153_v13 = vld [vmem:[%s308_s3] ss:$0 sm:$0xff]  ;;  %v41_v14 = vadd.f32 %v40_v9, %v32_v4  ;;  %v36_v15 = vmul.f32 %v35_v10, %v33_v6  ;;  %v45_v18 = vmul.f32 0.1, %v32_v4  ;;  %s127_s5 = sshll.u32 %s224_s4, 4  ;;  %s225_s15 = smov [#allocation2]   ;;  %s128_s5 = int_to_ptr.vmem [resolvable:$true] %s127_s5 }
   0x8   :  { %v53_v20 = vmul.f32 %v153_v13, %v28_v12  ;;  %s117_s16 = sshll.u32 %s225_s15, 4  ;;  %v66_v25 = vrot.slane %v33_v6, %v57_v16  ;;  %v72_v28 = vmul.f32 0.1, %v33_v6  ;;  %vm86_vm1 = vcmask 257024   ;;  %s159_s0 = scalar_lea.vmem %s128_s5, 16  ;;  %s118_s16 = int_to_ptr.vmem [resolvable:$true] %s117_s16 }
   0x9   :  { %v152_v17 = vclamps-f32 %v41_v14, 5.0  ;;  %v39_v19 = vadd.f32 %v38_v11, %v36_v15  ;;  %p160_p0 = scmp.ne.s32.totalorder %s128_s5, %s159_s0  ;;  %s163_s3 = scalar_lea.vmem %s128_s5, 32 }
   0xa   :  { %p164_p1 = scmp.lt.s32.totalorder %s128_s5, %s128_s5  ;;  %p165_p2 = scmp.lt.s32.totalorder %s163_s3, %s159_s0 }
   0xb   :  { %v44_v21 = vmul.f32 0.9, %v152_v17  ;;  %v58_v22 = vrot.slane %v39_v19, %v57_v16 }
   0xc   :  { %p166_p3 = por %p165_p2, %p164_p1 }
   0xd   :  { %v46_v23 = vadd.f32 %v45_v18, %v44_v21  ;;  %v60_v24 = vsub.f32 %v53_v20, %v58_v22 }
   0xe   :  { %p167_p4 = pnand %p166_p3, %p160_p0 }
   0xf   :  { %89 = vst.msk [vmem:[#allocation4] sm:$0x1] %vm88_vm0, %v46_v23  ;;  %v84_v26 = vrot.slane %v46_v23, %v57_v16  ;;  %v61_v27 = vmul.f32 0.5, %v60_v24 }
  0x10   :  { %170 = shalt.err (!%p167_p4)
}
  0x11   :  { %130 = dma.vmem_to_hbm [thread:$0]  %s128_s5, 16, %s312_s7, [#allocation5]   ;;  %87 = vst.msk [vmem:[#allocation2] sm:$0xf] %vm86_vm1, %v84_v26  ;;  %v68_v29 = vadd.f32 %v66_v25, %v61_v27 }
  0x12   :  { %s179_s19 = scalar_lea.vmem %s118_s16, 64  ;;  %p184_p6 = scmp.lt.s32.totalorder %s118_s16, %s118_s16 }
  0x13   :  { %p180_p5 = scmp.ne.s32.totalorder %s118_s16, %s179_s19  ;;  %p185_p7 = scmp.lt.s32.totalorder %s179_s19, %s179_s19 }
  0x15   :  { %p186_p8 = por %p185_p7, %p184_p6 }
  0x17   :  { %p187_p9 = pnand %p186_p8, %p180_p5 }
  0x19   :  { %190 = shalt.err (!%p187_p9)
}
  0x1a   :  { %120 = dma.vmem_to_hbm [thread:$0]  %s118_s16, 64, %s311_s6, [#allocation3]   ;;  %v154_v30 = vclamps-f32 %v68_v29, 5.0  ;;  %v77_v31 = vrot.slane %v72_v28, %v57_v16  ;;  %v102_v40 = vld [vmem:[#allocation6] sm:$0x1] }
  0x1b   :  { %s226_s7 = smov [#allocation6]  }
  0x1c   :  { %v71_v32 = vmul.f32 0.9, %v154_v30  ;;  %s137_s22 = sshll.u32 %s226_s7, 4  ;;  %s138_s22 = int_to_ptr.vmem [resolvable:$true] %s137_s22 }
  0x1d   :  { %s199_s6 = scalar_lea.vmem %s138_s22, 16  ;;  %s203_s23 = scalar_lea.vmem %s138_s22, 32 }
  0x1e   :  { %v79_v33 = vadd.f32 %v77_v31, %v71_v32  ;;  %p200_p10 = scmp.ne.s32.totalorder %s138_s22, %s199_s6  ;;  %p204_p11 = scmp.lt.s32.totalorder %s138_s22, %s138_s22 }
  0x1f   :  { %p205_p12 = scmp.lt.s32.totalorder %s203_s23, %s199_s6 }
  0x20   :  { %v95_v34 = vsel %vm86_vm1, %v79_v33, 0.0 }
  0x21   :  { %v96_v35 = vrot.slane %v95_v34, 4  ;;  %p206_p13 = por %p205_p12, %p204_p11 }
  0x23   :  { %v97_v36 = vadd.f32 %v96_v35, %v95_v34  ;;  %p207_p0 = pnand %p206_p13, %p200_p10 }
  0x25   :  { %v98_v37 = vrot.slane %v97_v36, 2 }
  0x27   :  { %v99_v38 = vadd.f32 %v98_v37, %v97_v36 }
  0x29   :  { %v100_v39 = vrot.slane %v99_v38, 1 }
  0x2b   :  { %v101_v41 = vadd.f32 %v100_v39, %v99_v38 }
  0x2d   :  { %v103_v42 = vadd.f32 %v102_v40, %v101_v41 }
  0x2f   :  { %104 = vst.msk [vmem:[#allocation6] sm:$0x1] %vm88_vm0, %v103_v42 }
  0x36   :  { %v108_v43 = vld [vmem:[#allocation6] sm:$0x1] }
  0x37   :  { %v109_v44 = vmul.f32 0.25, %v108_v43 }
  0x39   :  { %110 = vst.msk [vmem:[#allocation6] sm:$0x1] %vm88_vm0, %v109_v44 }
  0x3a   :  { %210 = shalt.err (!%p207_p0)
}
  0x3b   :  { %140 = dma.vmem_to_hbm [thread:$0]  %s138_s22, 16, %s313_s8, [#allocation5]  }
  0x3c   :  { %219 = dma.done.wait [#allocation3], 64  }
  0x3d   :  { %220 = vsyncadd [#allocation3], 4294967232 }
  0x3e   :  { %221 = dma.done.wait [#allocation5], 32  }
  0x3f   :  { %222 = vsyncadd [#allocation5], 4294967264 }
  0x40   :  { %150 = vsyncpa [#allocation3], 1 }
  0x41   :  { %151 = vsyncpa [#allocation5], 1 }

</bundles_post_ra>
